<compile_context>
chip_gen: v7x
topology: tpu7x:2x2x1
jax: 0.10.0
libtpu: 0.0.40
codegen_flags: <defaults>
</compile_context>

<pallas_src>
import math
import functools

import numpy as np
import jax
import jax.numpy as jnp
from jax.experimental import pallas as pl
from jax.experimental.pallas import tpu as pltpu


def _mhca_kernel(*refs, num_heads, qk_hidden, v_hidden, use_mask, return_att):
    # --- unpack refs (mask / att are optional) ---------------------------------
    q_in_ref, kv_in_ref = refs[0], refs[1]
    i = 2
    mask_ref = None
    if use_mask:
        mask_ref = refs[i]
        i += 1
    wq_ref, bq_ref, wkv_ref, bkv_ref, wo_ref, bo_ref = refs[i:i + 6]
    i += 6
    out_ref = refs[i]
    i += 1
    att_ref = refs[i] if return_att else None

    H = num_heads
    Bb, Nq, Dq = q_in_ref.shape
    _, Nk, Dkv = kv_in_ref.shape
    O = H * v_hidden
    mm_dtype = q_in_ref.dtype            # f32 or bf16 (chosen by the wrapper)

    # --- fused projections on row-flattened operands (big MXU matmuls) ---------
    q_in = q_in_ref[...].reshape(Bb * Nq, Dq)
    kv_in = kv_in_ref[...].reshape(Bb * Nk, Dkv)
    # 1/sqrt(dk) scale already folded into wq/bq by the wrapper.
    q_all = jnp.dot(q_in, wq_ref[...], preferred_element_type=jnp.float32) + bq_ref[...]
    kv_all = jnp.dot(kv_in, wkv_ref[...], preferred_element_type=jnp.float32) + bkv_ref[...]

    # Contiguous K / V slabs (wkv columns reordered in the wrapper).
    q3 = q_all.reshape(Bb, Nq, H * qk_hidden)
    k3 = kv_all[:, :H * qk_hidden].reshape(Bb, Nk, H * qk_hidden)
    v3 = kv_all[:, H * qk_hidden:].reshape(Bb, Nk, H * v_hidden)

    neg = jnp.finfo(jnp.float32).min
    if use_mask:
        mask_vals = mask_ref[...]                                        # (Bb, Nq, Nk), f32
        mask_zero = mask_vals == 0
        valid_q = jnp.any(mask_vals != 0, axis=-1, keepdims=True)        # (Bb, Nq, 1)

    ctx_heads = []
    att_heads = []
    for h in range(H):                   # static unroll over heads
        q_h = q3[:, :, h * qk_hidden:(h + 1) * qk_hidden]                # (Bb, Nq, qkh)
        k_h = k3[:, :, h * qk_hidden:(h + 1) * qk_hidden]                # (Bb, Nk, qkh)
        v_h = v3[:, :, h * v_hidden:(h + 1) * v_hidden]                  # (Bb, Nk, vh)

        # Contract on the shared last dim — no explicit transpose of K in VMEM.
        s = jnp.einsum('bqd,bkd->bqk', q_h.astype(mm_dtype), k_h.astype(mm_dtype),
                       preferred_element_type=jnp.float32)               # (Bb, Nq, Nk)
        if use_mask:
            s = jnp.where(mask_zero, neg, s)

        # f32 softmax; divide goes to the EUP via approximate reciprocal.
        m = jnp.max(s, axis=-1, keepdims=True)
        e = jnp.exp(s - m)
        p = e * pl.reciprocal(jnp.sum(e, axis=-1, keepdims=True), approx=True)
        if return_att:
            att_heads.append(p[:, None])                                 # (Bb, 1, Nq, Nk)

        ctx_heads.append(jnp.einsum('bqk,bkd->bqd', p.astype(mm_dtype),
                                    v_h.astype(mm_dtype),
                                    preferred_element_type=jnp.float32))  # (Bb, Nq, vh)

    ctx = jnp.concatenate(ctx_heads, axis=-1)                            # (Bb, Nq, O)
    out = jnp.dot(ctx.reshape(Bb * Nq, O).astype(mm_dtype), wo_ref[...],
                  preferred_element_type=jnp.float32) + bo_ref[...]
    out = out.reshape(Bb, Nq, O)
    if use_mask:
        # Zero rows whose query has no valid key (padded queries).
        out = jnp.where(valid_q, out, 0.0)

    out_ref[...] = out.astype(out_ref.dtype)
    if return_att:
        # Single block store instead of H partial stores.
        att_ref[...] = jnp.concatenate(att_heads, axis=1)                # (Bb, H, Nq, Nk)


def multihead_cross_attention(q_input, kv_input, params, *, num_heads,
                              qk_hidden, v_hidden, mask=None,
                              batch_block=None, compute_dtype=jnp.float32,
                              return_att=True):
    B, Nq, Dq = q_input.shape
    Bk, Nk, Dkv = kv_input.shape
    assert B == Bk, "batch size are not equal"
    H = num_heads
    O = H * v_hidden

    Bb = B if batch_block is None else batch_block
    assert B % Bb == 0, "batch_block must divide batch"

    use_mask = mask is not None
    wq, bq, wkv, bkv, wo, bo = params    # weights (in, out); biases (1, out)

    # Fold the 1/sqrt(dk) scale into the Q projection (free at runtime).
    scale = 1.0 / math.sqrt(qk_hidden)
    wq = wq * scale
    bq = bq * scale

    # Reorder kv_proj columns: per-head interleaved [K_h | V_h] ->
    # [K_0..K_{H-1} | V_0..V_{H-1}] so kernel K/V slices are contiguous slabs.
    kv_step = qk_hidden + v_hidden
    k_cols = np.concatenate([np.arange(h * kv_step, h * kv_step + qk_hidden) for h in range(H)])
    v_cols = np.concatenate([np.arange(h * kv_step + qk_hidden, (h + 1) * kv_step) for h in range(H)])
    perm = np.concatenate([k_cols, v_cols])
    wkv = wkv[:, perm]
    bkv = bkv[:, perm]

    # Optional bf16 MXU inputs (v6e/v7x). Biases / softmax / accumulation stay f32.
    if compute_dtype != jnp.float32:
        q_input = q_input.astype(compute_dtype)
        kv_input = kv_input.astype(compute_dtype)
        wq = wq.astype(compute_dtype)
        wkv = wkv.astype(compute_dtype)
        wo = wo.astype(compute_dtype)

    args = [q_input, kv_input]
    in_specs = [
        pl.BlockSpec((Bb, Nq, Dq), lambda b: (b, 0, 0)),
        pl.BlockSpec((Bb, Nk, Dkv), lambda b: (b, 0, 0)),
    ]
    if use_mask:
        args.append(mask.astype(jnp.float32))
        in_specs.append(pl.BlockSpec((Bb, Nq, Nk), lambda b: (b, 0, 0)))
    for w in (wq, bq, wkv, bkv, wo, bo):
        args.append(w)
        in_specs.append(pl.BlockSpec(w.shape, lambda b, _n=w.ndim: (0,) * _n))

    out_shapes = [jax.ShapeDtypeStruct((B, Nq, O), jnp.float32)]
    out_specs = [pl.BlockSpec((Bb, Nq, O), lambda b: (b, 0, 0))]
    if return_att:
        out_shapes.append(jax.ShapeDtypeStruct((B, H, Nq, Nk), jnp.float32))
        out_specs.append(pl.BlockSpec((Bb, H, Nq, Nk), lambda b: (b, 0, 0, 0)))

    kernel = functools.partial(_mhca_kernel, num_heads=H, qk_hidden=qk_hidden,
                               v_hidden=v_hidden, use_mask=use_mask,
                               return_att=return_att)

    f = pl.pallas_call(
        kernel,
        out_shape=tuple(out_shapes),
        grid=(B // Bb,),
        in_specs=in_specs,
        out_specs=tuple(out_specs),
        compiler_params=pltpu.CompilerParams(dimension_semantics=("parallel",)),
    )
    results = f(*args)
    if return_att:
        return results
    (out,) = results
    return out, None


def reference(q_input, kv_input, params, *, num_heads, qk_hidden, v_hidden, mask=None):
    """Pure-jnp reference matching the PyTorch forward (eval mode)."""
    wq, bq, wkv, bkv, wo, bo = params
    B, Nq, _ = q_input.shape
    _, Nk, _ = kv_input.shape
    q = q_input @ wq + bq
    q = q.reshape(B, Nq, num_heads, qk_hidden).transpose(0, 2, 1, 3)
    kv = kv_input @ wkv + bkv
    kv = kv.reshape(B, Nk, num_heads, qk_hidden + v_hidden).transpose(0, 2, 1, 3)
    k, v = kv[..., :qk_hidden], kv[..., qk_hidden:]
    scores = q @ jnp.swapaxes(k, -1, -2) / math.sqrt(qk_hidden)
    if mask is not None:
        scores = jnp.where(mask[:, None] == 0, jnp.finfo(scores.dtype).min, scores)
    p = jax.nn.softmax(scores, axis=-1)
    ctx = (p @ v).transpose(0, 2, 1, 3).reshape(B, Nq, num_heads * v_hidden)
    out = ctx @ wo + bo
    if mask is not None:
        padded = ~jnp.any(mask, axis=-1)
        out = jnp.where(padded[..., None], 0.0, out)
    return out, p


def init_params(key, q_input_len, kv_input_len, output_len, num_heads, qk_hidden, v_hidden):
    """Deterministic PyTorch-Linear-style uniform init, weights stored (in, out)."""
    ks = jax.random.split(key, 6)

    def lin(kw, kb, fan_in, fan_out):
        bound = 1.0 / math.sqrt(fan_in)
        w = jax.random.uniform(kw, (fan_in, fan_out), jnp.float32, -bound, bound)
        b = jax.random.uniform(kb, (1, fan_out), jnp.float32, -bound, bound)
        return w, b

    wq, bq = lin(ks[0], ks[1], q_input_len, num_heads * qk_hidden)
    wkv, bkv = lin(ks[2], ks[3], kv_input_len, num_heads * (qk_hidden + v_hidden))
    wo, bo = lin(ks[4], ks[5], output_len, output_len)
    return wq, bq, wkv, bkv, wo, bo


if __name__ == "__main__":
    # Module config
    q_input_len, kv_input_len, output_len, num_heads = 32, 24, 32, 4
    qk_hidden = q_input_len            # default qk_hidden_len
    v_hidden = output_len // num_heads

    B, Nq, Nk = 2, 8, 8

    key = jax.random.PRNGKey(0)
    k_params, k_q, k_kv = jax.random.split(key, 3)
    params = init_params(k_params, q_input_len, kv_input_len, output_len,
                         num_heads, qk_hidden, v_hidden)

    q_input = jax.random.normal(k_q, (B, Nq, q_input_len), jnp.float32)
    kv_input = jax.random.normal(k_kv, (B, Nk, kv_input_len), jnp.float32)

    # Boolean mask [B, Nq, Nk]; batch 1 has shorter keys and two fully-padded queries.
    key_valid = jnp.arange(Nk)[None, None, :] < jnp.array([Nk, 5])[:, None, None]
    mask = jnp.broadcast_to(key_valid, (B, Nq, Nk))
    mask = mask.at[1, 6:, :].set(False)

    # --- masked path (f32 compute, whole batch per grid step) ------------------
    out, att = multihead_cross_attention(
        q_input, kv_input, params, num_heads=num_heads,
        qk_hidden=qk_hidden, v_hidden=v_hidden, mask=mask, batch_block=B)
    out = jax.block_until_ready(out)
    att = jax.block_until_ready(att)

    ref_out, ref_att = reference(q_input, kv_input, params, num_heads=num_heads,
                                 qk_hidden=qk_hidden, v_hidden=v_hidden, mask=mask)

    assert out.shape == (B, Nq, output_len)
    assert att.shape == (B, num_heads, Nq, Nk)
    assert jnp.allclose(out, ref_out, atol=5e-3, rtol=5e-3)
    assert jnp.allclose(att, ref_att, atol=5e-3, rtol=5e-3)

    # --- mask=None path: no mask array is built or DMA'd -----------------------
    out2, att2 = multihead_cross_attention(
        q_input, kv_input, params, num_heads=num_heads,
        qk_hidden=qk_hidden, v_hidden=v_hidden, mask=None)
    jax.block_until_ready(out2)
    ref_out2, ref_att2 = reference(q_input, kv_input, params, num_heads=num_heads,
                                   qk_hidden=qk_hidden, v_hidden=v_hidden, mask=None)
    assert jnp.allclose(out2, ref_out2, atol=5e-3, rtol=5e-3)
    assert jnp.allclose(att2, ref_att2, atol=5e-3, rtol=5e-3)

    # --- skip the attention-prob writeback when the caller doesn't need it -----
    out3, _ = multihead_cross_attention(
        q_input, kv_input, params, num_heads=num_heads,
        qk_hidden=qk_hidden, v_hidden=v_hidden, mask=mask, return_att=False)
    jax.block_until_ready(out3)
    assert jnp.allclose(out3, ref_out, atol=5e-3, rtol=5e-3)

    # --- bf16 MXU path (v6e/v7x): half the DMA bytes, full-rate MXU ------------
    out4, att4 = multihead_cross_attention(
        q_input, kv_input, params, num_heads=num_heads,
        qk_hidden=qk_hidden, v_hidden=v_hidden, mask=mask,
        compute_dtype=jnp.bfloat16)
    jax.block_until_ready(out4)
    assert jnp.allclose(out4, ref_out, atol=5e-2, rtol=5e-2)

    print("KERNEL_OK")
</pallas_src>

<mosaic_0001>
module attributes {stable_mosaic.version = 11 : i64} {
  func.func @_mhca_kernel(%arg0: i32, %arg1: memref<2x8x32xf32, #tpu.memory_space<vmem>>, %arg2: memref<2x8x24xf32, #tpu.memory_space<vmem>>, %arg3: memref<2x8x8xf32, #tpu.memory_space<vmem>>, %arg4: memref<32x128xf32, #tpu.memory_space<vmem>>, %arg5: memref<1x128xf32, #tpu.memory_space<vmem>>, %arg6: memref<24x160xf32, #tpu.memory_space<vmem>>, %arg7: memref<1x160xf32, #tpu.memory_space<vmem>>, %arg8: memref<32x32xf32, #tpu.memory_space<vmem>>, %arg9: memref<1x32xf32, #tpu.memory_space<vmem>>, %arg10: memref<2x8x32xf32, #tpu.memory_space<vmem>>, %arg11: memref<2x4x8x8xf32, #tpu.memory_space<vmem>>) attributes {dimension_semantics = [#tpu.dimension_semantics<parallel>], iteration_bounds = array<i64: 1>, scalar_prefetch = 0 : i64, scratch_operands = 0 : i64, tpu.core_type = #tpu.core_type<tc>, window_params = [{transform_indices = @transform_0, window_bounds = array<i64: 2, 8, 32>}, {transform_indices = @transform_1, window_bounds = array<i64: 2, 8, 24>}, {transform_indices = @transform_2, window_bounds = array<i64: 2, 8, 8>}, {pipeline_mode = #tpu.pipeline_mode<synchronous>, transform_indices = @transform_3, window_bounds = array<i64: 32, 128>}, {pipeline_mode = #tpu.pipeline_mode<synchronous>, transform_indices = @transform_4, window_bounds = array<i64: 1, 128>}, {pipeline_mode = #tpu.pipeline_mode<synchronous>, transform_indices = @transform_5, window_bounds = array<i64: 24, 160>}, {pipeline_mode = #tpu.pipeline_mode<synchronous>, transform_indices = @transform_6, window_bounds = array<i64: 1, 160>}, {pipeline_mode = #tpu.pipeline_mode<synchronous>, transform_indices = @transform_7, window_bounds = array<i64: 32, 32>}, {pipeline_mode = #tpu.pipeline_mode<synchronous>, transform_indices = @transform_8, window_bounds = array<i64: 1, 32>}, {transform_indices = @transform_9, window_bounds = array<i64: 2, 8, 32>}, {transform_indices = @transform_10, window_bounds = array<i64: 2, 4, 8, 8>}]} {
    %c0 = arith.constant 0 : index
    %c0_0 = arith.constant 0 : index
    %c0_1 = arith.constant 0 : index
    %0 = vector.load %arg1[%c0, %c0_0, %c0_1] : memref<2x8x32xf32, #tpu.memory_space<vmem>>, vector<2x8x32xf32>
    %1 = vector.shape_cast %0 : vector<2x8x32xf32> to vector<16x32xf32>
    %c0_2 = arith.constant 0 : index
    %c0_3 = arith.constant 0 : index
    %c0_4 = arith.constant 0 : index
    %2 = vector.load %arg2[%c0_2, %c0_3, %c0_4] : memref<2x8x24xf32, #tpu.memory_space<vmem>>, vector<2x8x24xf32>
    %3 = vector.shape_cast %2 : vector<2x8x24xf32> to vector<16x24xf32>
    %c0_5 = arith.constant 0 : index
    %c0_6 = arith.constant 0 : index
    %4 = vector.load %arg4[%c0_5, %c0_6] : memref<32x128xf32, #tpu.memory_space<vmem>>, vector<32x128xf32>
    %cst = arith.constant dense<0.000000e+00> : vector<16x128xf32>
    %5 = tpu.matmul %1, %4, %cst {dimension_numbers = #tpu.dot_dimension_numbers<[1], [0], [0], [1], [0, 0, 1, 1], [], []>} : vector<16x32xf32>, vector<32x128xf32>, vector<16x128xf32> -> vector<16x128xf32>
    %c0_7 = arith.constant 0 : index
    %c0_8 = arith.constant 0 : index
    %6 = vector.load %arg5[%c0_7, %c0_8] : memref<1x128xf32, #tpu.memory_space<vmem>>, vector<1x128xf32>
    %7 = vector.broadcast %6 : vector<1x128xf32> to vector<16x128xf32>
    %8 = arith.addf %5, %7 : vector<16x128xf32>
    %c0_9 = arith.constant 0 : index
    %c0_10 = arith.constant 0 : index
    %9 = vector.load %arg6[%c0_9, %c0_10] : memref<24x160xf32, #tpu.memory_space<vmem>>, vector<24x160xf32>
    %cst_11 = arith.constant dense<0.000000e+00> : vector<16x160xf32>
    %10 = tpu.matmul %3, %9, %cst_11 {dimension_numbers = #tpu.dot_dimension_numbers<[1], [0], [0], [1], [0, 0, 1, 1], [], []>} : vector<16x24xf32>, vector<24x160xf32>, vector<16x160xf32> -> vector<16x160xf32>
    %c0_12 = arith.constant 0 : index
    %c0_13 = arith.constant 0 : index
    %11 = vector.load %arg7[%c0_12, %c0_13] : memref<1x160xf32, #tpu.memory_space<vmem>>, vector<1x160xf32>
    %12 = vector.broadcast %11 : vector<1x160xf32> to vector<16x160xf32>
    %13 = arith.addf %10, %12 : vector<16x160xf32>
    %14 = vector.shape_cast %8 : vector<16x128xf32> to vector<2x8x128xf32>
    %15 = vector.extract_strided_slice %13 {offsets = [0, 0], sizes = [16, 128], strides = [1, 1]} : vector<16x160xf32> to vector<16x128xf32>
    %16 = vector.shape_cast %15 : vector<16x128xf32> to vector<2x8x128xf32>
    %17 = vector.extract_strided_slice %13 {offsets = [0, 128], sizes = [16, 32], strides = [1, 1]} : vector<16x160xf32> to vector<16x32xf32>
    %18 = vector.shape_cast %17 : vector<16x32xf32> to vector<2x8x32xf32>
    %c0_14 = arith.constant 0 : index
    %c0_15 = arith.constant 0 : index
    %c0_16 = arith.constant 0 : index
    %19 = vector.load %arg3[%c0_14, %c0_15, %c0_16] : memref<2x8x8xf32, #tpu.memory_space<vmem>>, vector<2x8x8xf32>
    %cst_17 = arith.constant 0.000000e+00 : f32
    %20 = vector.broadcast %cst_17 : f32 to vector<2x8x8xf32>
    %21 = arith.cmpf oeq, %19, %20 : vector<2x8x8xf32>
    %cst_18 = arith.constant 0.000000e+00 : f32
    %22 = vector.broadcast %cst_18 : f32 to vector<2x8x8xf32>
    %23 = arith.cmpf one, %19, %22 : vector<2x8x8xf32>
    %cst_19 = arith.constant 1.000000e+00 : f32
    %cst_20 = arith.constant 0.000000e+00 : f32
    %24 = vector.broadcast %cst_19 : f32 to vector<2x8x8xf32>
    %25 = vector.broadcast %cst_20 : f32 to vector<2x8x8xf32>
    %26 = arith.select %23, %24, %25 : vector<2x8x8xi1>, vector<2x8x8xf32>
    %cst_21 = arith.constant dense<0xFF800000> : vector<2x8xf32>
    %27 = vector.multi_reduction <maximumf>, %26, %cst_21 [2] : vector<2x8x8xf32> to vector<2x8xf32>
    %cst_22 = arith.constant 0.000000e+00 : f32
    %28 = vector.broadcast %cst_22 : f32 to vector<2x8xf32>
    %29 = arith.cmpf ogt, %27, %28 : vector<2x8xf32>
    %30 = vector.shape_cast %29 : vector<2x8xi1> to vector<2x8x1xi1>
    %31 = vector.extract_strided_slice %14 {offsets = [0, 0, 0], sizes = [2, 8, 32], strides = [1, 1, 1]} : vector<2x8x128xf32> to vector<2x8x32xf32>
    %32 = vector.extract_strided_slice %16 {offsets = [0, 0, 0], sizes = [2, 8, 32], strides = [1, 1, 1]} : vector<2x8x128xf32> to vector<2x8x32xf32>
    %33 = vector.extract_strided_slice %18 {offsets = [0, 0, 0], sizes = [2, 8, 8], strides = [1, 1, 1]} : vector<2x8x32xf32> to vector<2x8x8xf32>
    "tpu.trace_start"() <{level = 10 : i32, message = "bqd,bkd->bqk"}> : () -> ()
    %cst_23 = arith.constant dense<0.000000e+00> : vector<2x8x8xf32>
    %34 = tpu.matmul %31, %32, %cst_23 {dimension_numbers = #tpu.dot_dimension_numbers<[2], [2], [1], [1], [0, 0, 0, 1, 1, 1], [0], [0]>} : vector<2x8x32xf32>, vector<2x8x32xf32>, vector<2x8x8xf32> -> vector<2x8x8xf32>
    %cst_24 = arith.constant -3.40282347E+38 : f32
    "tpu.trace_stop"() : () -> ()
    %35 = vector.broadcast %cst_24 : f32 to vector<2x8x8xf32>
    %36 = arith.select %21, %35, %34 : vector<2x8x8xi1>, vector<2x8x8xf32>
    %cst_25 = arith.constant dense<0xFF800000> : vector<2x8xf32>
    %37 = vector.multi_reduction <maximumf>, %36, %cst_25 [2] : vector<2x8x8xf32> to vector<2x8xf32>
    %38 = vector.shape_cast %37 : vector<2x8xf32> to vector<2x8x1xf32>
    %39 = vector.broadcast %38 : vector<2x8x1xf32> to vector<2x8x8xf32>
    %40 = arith.subf %36, %39 : vector<2x8x8xf32>
    %41 = math.exp %40 : vector<2x8x8xf32>
    %cst_26 = arith.constant dense<0.000000e+00> : vector<2x8xf32>
    %42 = vector.multi_reduction <add>, %41, %cst_26 [2] : vector<2x8x8xf32> to vector<2x8xf32>
    %43 = vector.shape_cast %42 : vector<2x8xf32> to vector<2x8x1xf32>
    %44 = tpu.reciprocal %43 {approx = true} : vector<2x8x1xf32> -> vector<2x8x1xf32>
    %45 = vector.broadcast %44 : vector<2x8x1xf32> to vector<2x8x8xf32>
    %46 = arith.mulf %41, %45 : vector<2x8x8xf32>
    %47 = vector.shape_cast %46 : vector<2x8x8xf32> to vector<2x1x8x8xf32>
    "tpu.trace_start"() <{level = 10 : i32, message = "bqk,bkd->bqd"}> : () -> ()
    %cst_27 = arith.constant dense<0.000000e+00> : vector<2x8x8xf32>
    %48 = tpu.matmul %46, %33, %cst_27 {dimension_numbers = #tpu.dot_dimension_numbers<[2], [1], [1], [2], [0, 0, 0, 1, 1, 2], [0], [0]>} : vector<2x8x8xf32>, vector<2x8x8xf32>, vector<2x8x8xf32> -> vector<2x8x8xf32>
    "tpu.trace_stop"() : () -> ()
    %49 = vector.extract_strided_slice %14 {offsets = [0, 0, 32], sizes = [2, 8, 32], strides = [1, 1, 1]} : vector<2x8x128xf32> to vector<2x8x32xf32>
    %50 = vector.extract_strided_slice %16 {offsets = [0, 0, 32], sizes = [2, 8, 32], strides = [1, 1, 1]} : vector<2x8x128xf32> to vector<2x8x32xf32>
    %51 = vector.extract_strided_slice %18 {offsets = [0, 0, 8], sizes = [2, 8, 8], strides = [1, 1, 1]} : vector<2x8x32xf32> to vector<2x8x8xf32>
    "tpu.trace_start"() <{level = 10 : i32, message = "bqd,bkd->bqk"}> : () -> ()
    %cst_28 = arith.constant dense<0.000000e+00> : vector<2x8x8xf32>
    %52 = tpu.matmul %49, %50, %cst_28 {dimension_numbers = #tpu.dot_dimension_numbers<[2], [2], [1], [1], [0, 0, 0, 1, 1, 1], [0], [0]>} : vector<2x8x32xf32>, vector<2x8x32xf32>, vector<2x8x8xf32> -> vector<2x8x8xf32>
    %cst_29 = arith.constant -3.40282347E+38 : f32
    "tpu.trace_stop"() : () -> ()
    %53 = vector.broadcast %cst_29 : f32 to vector<2x8x8xf32>
    %54 = arith.select %21, %53, %52 : vector<2x8x8xi1>, vector<2x8x8xf32>
    %cst_30 = arith.constant dense<0xFF800000> : vector<2x8xf32>
    %55 = vector.multi_reduction <maximumf>, %54, %cst_30 [2] : vector<2x8x8xf32> to vector<2x8xf32>
    %56 = vector.shape_cast %55 : vector<2x8xf32> to vector<2x8x1xf32>
    %57 = vector.broadcast %56 : vector<2x8x1xf32> to vector<2x8x8xf32>
    %58 = arith.subf %54, %57 : vector<2x8x8xf32>
    %59 = math.exp %58 : vector<2x8x8xf32>
    %cst_31 = arith.constant dense<0.000000e+00> : vector<2x8xf32>
    %60 = vector.multi_reduction <add>, %59, %cst_31 [2] : vector<2x8x8xf32> to vector<2x8xf32>
    %61 = vector.shape_cast %60 : vector<2x8xf32> to vector<2x8x1xf32>
    %62 = tpu.reciprocal %61 {approx = true} : vector<2x8x1xf32> -> vector<2x8x1xf32>
    %63 = vector.broadcast %62 : vector<2x8x1xf32> to vector<2x8x8xf32>
    %64 = arith.mulf %59, %63 : vector<2x8x8xf32>
    %65 = vector.shape_cast %64 : vector<2x8x8xf32> to vector<2x1x8x8xf32>
    "tpu.trace_start"() <{level = 10 : i32, message = "bqk,bkd->bqd"}> : () -> ()
    %cst_32 = arith.constant dense<0.000000e+00> : vector<2x8x8xf32>
    %66 = tpu.matmul %64, %51, %cst_32 {dimension_numbers = #tpu.dot_dimension_numbers<[2], [1], [1], [2], [0, 0, 0, 1, 1, 2], [0], [0]>} : vector<2x8x8xf32>, vector<2x8x8xf32>, vector<2x8x8xf32> -> vector<2x8x8xf32>
    "tpu.trace_stop"() : () -> ()
    %67 = vector.extract_strided_slice %14 {offsets = [0, 0, 64], sizes = [2, 8, 32], strides = [1, 1, 1]} : vector<2x8x128xf32> to vector<2x8x32xf32>
    %68 = vector.extract_strided_slice %16 {offsets = [0, 0, 64], sizes = [2, 8, 32], strides = [1, 1, 1]} : vector<2x8x128xf32> to vector<2x8x32xf32>
    %69 = vector.extract_strided_slice %18 {offsets = [0, 0, 16], sizes = [2, 8, 8], strides = [1, 1, 1]} : vector<2x8x32xf32> to vector<2x8x8xf32>
    "tpu.trace_start"() <{level = 10 : i32, message = "bqd,bkd->bqk"}> : () -> ()
    %cst_33 = arith.constant dense<0.000000e+00> : vector<2x8x8xf32>
    %70 = tpu.matmul %67, %68, %cst_33 {dimension_numbers = #tpu.dot_dimension_numbers<[2], [2], [1], [1], [0, 0, 0, 1, 1, 1], [0], [0]>} : vector<2x8x32xf32>, vector<2x8x32xf32>, vector<2x8x8xf32> -> vector<2x8x8xf32>
    %cst_34 = arith.constant -3.40282347E+38 : f32
    "tpu.trace_stop"() : () -> ()
    %71 = vector.broadcast %cst_34 : f32 to vector<2x8x8xf32>
    %72 = arith.select %21, %71, %70 : vector<2x8x8xi1>, vector<2x8x8xf32>
    %cst_35 = arith.constant dense<0xFF800000> : vector<2x8xf32>
    %73 = vector.multi_reduction <maximumf>, %72, %cst_35 [2] : vector<2x8x8xf32> to vector<2x8xf32>
    %74 = vector.shape_cast %73 : vector<2x8xf32> to vector<2x8x1xf32>
    %75 = vector.broadcast %74 : vector<2x8x1xf32> to vector<2x8x8xf32>
    %76 = arith.subf %72, %75 : vector<2x8x8xf32>
    %77 = math.exp %76 : vector<2x8x8xf32>
    %cst_36 = arith.constant dense<0.000000e+00> : vector<2x8xf32>
    %78 = vector.multi_reduction <add>, %77, %cst_36 [2] : vector<2x8x8xf32> to vector<2x8xf32>
    %79 = vector.shape_cast %78 : vector<2x8xf32> to vector<2x8x1xf32>
    %80 = tpu.reciprocal %79 {approx = true} : vector<2x8x1xf32> -> vector<2x8x1xf32>
    %81 = vector.broadcast %80 : vector<2x8x1xf32> to vector<2x8x8xf32>
    %82 = arith.mulf %77, %81 : vector<2x8x8xf32>
    %83 = vector.shape_cast %82 : vector<2x8x8xf32> to vector<2x1x8x8xf32>
    "tpu.trace_start"() <{level = 10 : i32, message = "bqk,bkd->bqd"}> : () -> ()
    %cst_37 = arith.constant dense<0.000000e+00> : vector<2x8x8xf32>
    %84 = tpu.matmul %82, %69, %cst_37 {dimension_numbers = #tpu.dot_dimension_numbers<[2], [1], [1], [2], [0, 0, 0, 1, 1, 2], [0], [0]>} : vector<2x8x8xf32>, vector<2x8x8xf32>, vector<2x8x8xf32> -> vector<2x8x8xf32>
    "tpu.trace_stop"() : () -> ()
    %85 = vector.extract_strided_slice %14 {offsets = [0, 0, 96], sizes = [2, 8, 32], strides = [1, 1, 1]} : vector<2x8x128xf32> to vector<2x8x32xf32>
    %86 = vector.extract_strided_slice %16 {offsets = [0, 0, 96], sizes = [2, 8, 32], strides = [1, 1, 1]} : vector<2x8x128xf32> to vector<2x8x32xf32>
    %87 = vector.extract_strided_slice %18 {offsets = [0, 0, 24], sizes = [2, 8, 8], strides = [1, 1, 1]} : vector<2x8x32xf32> to vector<2x8x8xf32>
    "tpu.trace_start"() <{level = 10 : i32, message = "bqd,bkd->bqk"}> : () -> ()
    %cst_38 = arith.constant dense<0.000000e+00> : vector<2x8x8xf32>
    %88 = tpu.matmul %85, %86, %cst_38 {dimension_numbers = #tpu.dot_dimension_numbers<[2], [2], [1], [1], [0, 0, 0, 1, 1, 1], [0], [0]>} : vector<2x8x32xf32>, vector<2x8x32xf32>, vector<2x8x8xf32> -> vector<2x8x8xf32>
    %cst_39 = arith.constant -3.40282347E+38 : f32
    "tpu.trace_stop"() : () -> ()
    %89 = vector.broadcast %cst_39 : f32 to vector<2x8x8xf32>
    %90 = arith.select %21, %89, %88 : vector<2x8x8xi1>, vector<2x8x8xf32>
    %cst_40 = arith.constant dense<0xFF800000> : vector<2x8xf32>
    %91 = vector.multi_reduction <maximumf>, %90, %cst_40 [2] : vector<2x8x8xf32> to vector<2x8xf32>
    %92 = vector.shape_cast %91 : vector<2x8xf32> to vector<2x8x1xf32>
    %93 = vector.broadcast %92 : vector<2x8x1xf32> to vector<2x8x8xf32>
    %94 = arith.subf %90, %93 : vector<2x8x8xf32>
    %95 = math.exp %94 : vector<2x8x8xf32>
    %cst_41 = arith.constant dense<0.000000e+00> : vector<2x8xf32>
    %96 = vector.multi_reduction <add>, %95, %cst_41 [2] : vector<2x8x8xf32> to vector<2x8xf32>
    %97 = vector.shape_cast %96 : vector<2x8xf32> to vector<2x8x1xf32>
    %98 = tpu.reciprocal %97 {approx = true} : vector<2x8x1xf32> -> vector<2x8x1xf32>
    %99 = vector.broadcast %98 : vector<2x8x1xf32> to vector<2x8x8xf32>
    %100 = arith.mulf %95, %99 : vector<2x8x8xf32>
    %101 = vector.shape_cast %100 : vector<2x8x8xf32> to vector<2x1x8x8xf32>
    "tpu.trace_start"() <{level = 10 : i32, message = "bqk,bkd->bqd"}> : () -> ()
    %cst_42 = arith.constant dense<0.000000e+00> : vector<2x8x8xf32>
    %102 = tpu.matmul %100, %87, %cst_42 {dimension_numbers = #tpu.dot_dimension_numbers<[2], [1], [1], [2], [0, 0, 0, 1, 1, 2], [0], [0]>} : vector<2x8x8xf32>, vector<2x8x8xf32>, vector<2x8x8xf32> -> vector<2x8x8xf32>
    "tpu.trace_stop"() : () -> ()
    %103 = tpu.concatenate %48, %66, %84, %102 in 2 : vector<2x8x8xf32>, vector<2x8x8xf32>, vector<2x8x8xf32>, vector<2x8x8xf32> -> vector<2x8x32xf32>
    %104 = vector.shape_cast %103 : vector<2x8x32xf32> to vector<16x32xf32>
    %c0_43 = arith.constant 0 : index
    %c0_44 = arith.constant 0 : index
    %105 = vector.load %arg8[%c0_43, %c0_44] : memref<32x32xf32, #tpu.memory_space<vmem>>, vector<32x32xf32>
    %cst_45 = arith.constant dense<0.000000e+00> : vector<16x32xf32>
    %106 = tpu.matmul %104, %105, %cst_45 {dimension_numbers = #tpu.dot_dimension_numbers<[1], [0], [0], [1], [0, 0, 1, 1], [], []>} : vector<16x32xf32>, vector<32x32xf32>, vector<16x32xf32> -> vector<16x32xf32>
    %c0_46 = arith.constant 0 : index
    %c0_47 = arith.constant 0 : index
    %107 = vector.load %arg9[%c0_46, %c0_47] : memref<1x32xf32, #tpu.memory_space<vmem>>, vector<1x32xf32>
    %108 = vector.broadcast %107 : vector<1x32xf32> to vector<16x32xf32>
    %109 = arith.addf %106, %108 : vector<16x32xf32>
    %110 = vector.shape_cast %109 : vector<16x32xf32> to vector<2x8x32xf32>
    %cst_48 = arith.constant 0.000000e+00 : f32
    %111 = vector.shape_cast %30 : vector<2x8x1xi1> to vector<2x8x1xi1>
    %112 = vector.broadcast %111 : vector<2x8x1xi1> to vector<2x8x32xi1>
    %113 = vector.broadcast %cst_48 : f32 to vector<2x8x32xf32>
    %114 = arith.select %112, %110, %113 : vector<2x8x32xi1>, vector<2x8x32xf32>
    %c0_49 = arith.constant 0 : index
    %c0_50 = arith.constant 0 : index
    %c0_51 = arith.constant 0 : index
    %115 = vector.load %arg10[%c0_49, %c0_50, %c0_51] : memref<2x8x32xf32, #tpu.memory_space<vmem>>, vector<2x8x32xf32>
    tpu.vector_store %arg10[%c0_49, %c0_50, %c0_51], %114 {strides = array<i32>} : memref<2x8x32xf32, #tpu.memory_space<vmem>>, vector<2x8x32xf32>,
    %116 = tpu.concatenate %47, %65, %83, %101 in 1 : vector<2x1x8x8xf32>, vector<2x1x8x8xf32>, vector<2x1x8x8xf32>, vector<2x1x8x8xf32> -> vector<2x4x8x8xf32>
    %c0_52 = arith.constant 0 : index
    %c0_53 = arith.constant 0 : index
    %c0_54 = arith.constant 0 : index
    %c0_55 = arith.constant 0 : index
    %117 = vector.load %arg11[%c0_52, %c0_53, %c0_54, %c0_55] : memref<2x4x8x8xf32, #tpu.memory_space<vmem>>, vector<2x4x8x8xf32>
    tpu.vector_store %arg11[%c0_52, %c0_53, %c0_54, %c0_55], %116 {strides = array<i32>} : memref<2x4x8x8xf32, #tpu.memory_space<vmem>>, vector<2x4x8x8xf32>,
    return
  }
  func.func @transform_0(%arg0: i32) -> (i32, i32, i32) {
    %c0_i32 = arith.constant 0 : i32
    %c0_i32_0 = arith.constant 0 : i32
    %c0_i32_1 = arith.constant 0 : i32
    return %arg0, %c0_i32, %c0_i32_0 : i32, i32, i32
  }
  func.func @transform_1(%arg0: i32) -> (i32, i32, i32) {
    %c0_i32 = arith.constant 0 : i32
    %c0_i32_0 = arith.constant 0 : i32
    %c0_i32_1 = arith.constant 0 : i32
    return %arg0, %c0_i32, %c0_i32_0 : i32, i32, i32
  }
  func.func @transform_2(%arg0: i32) -> (i32, i32, i32) {
    %c0_i32 = arith.constant 0 : i32
    %c0_i32_0 = arith.constant 0 : i32
    %c0_i32_1 = arith.constant 0 : i32
    return %arg0, %c0_i32, %c0_i32_0 : i32, i32, i32
  }
  func.func @transform_3(%arg0: i32) -> (i32, i32) {
    %c0_i32 = arith.constant 0 : i32
    %c0_i32_0 = arith.constant 0 : i32
    %c0_i32_1 = arith.constant 0 : i32
    return %c0_i32, %c0_i32_0 : i32, i32
  }
  func.func @transform_4(%arg0: i32) -> (i32, i32) {
    %c0_i32 = arith.constant 0 : i32
    %c0_i32_0 = arith.constant 0 : i32
    %c0_i32_1 = arith.constant 0 : i32
    return %c0_i32, %c0_i32_0 : i32, i32
  }
  func.func @transform_5(%arg0: i32) -> (i32, i32) {
    %c0_i32 = arith.constant 0 : i32
    %c0_i32_0 = arith.constant 0 : i32
    %c0_i32_1 = arith.constant 0 : i32
    return %c0_i32, %c0_i32_0 : i32, i32
  }
  func.func @transform_6(%arg0: i32) -> (i32, i32) {
    %c0_i32 = arith.constant 0 : i32
    %c0_i32_0 = arith.constant 0 : i32
    %c0_i32_1 = arith.constant 0 : i32
    return %c0_i32, %c0_i32_0 : i32, i32
  }
  func.func @transform_7(%arg0: i32) -> (i32, i32) {
    %c0_i32 = arith.constant 0 : i32
    %c0_i32_0 = arith.constant 0 : i32
    %c0_i32_1 = arith.constant 0 : i32
    return %c0_i32, %c0_i32_0 : i32, i32
  }
  func.func @transform_8(%arg0: i32) -> (i32, i32) {
    %c0_i32 = arith.constant 0 : i32
    %c0_i32_0 = arith.constant 0 : i32
    %c0_i32_1 = arith.constant 0 : i32
    return %c0_i32, %c0_i32_0 : i32, i32
  }
  func.func @transform_9(%arg0: i32) -> (i32, i32, i32) {
    %c0_i32 = arith.constant 0 : i32
    %c0_i32_0 = arith.constant 0 : i32
    %c0_i32_1 = arith.constant 0 : i32
    return %arg0, %c0_i32, %c0_i32_0 : i32, i32, i32
  }
  func.func @transform_10(%arg0: i32) -> (i32, i32, i32, i32) {
    %c0_i32 = arith.constant 0 : i32
    %c0_i32_0 = arith.constant 0 : i32
    %c0_i32_1 = arith.constant 0 : i32
    %c0_i32_2 = arith.constant 0 : i32
    return %arg0, %c0_i32, %c0_i32_0, %c0_i32_1 : i32, i32, i32, i32
  }
}

</mosaic_0001>

<bundles_post_ra>
// kernel: tpu_custom_call.1
= control target key start
LH: loop header
LB: loop body
LE: loop exit
PB: predicated region body
PF: predicated region fallthrough
CT: control target
= control target key end

     0   :  { %16 = vsyncpa [#allocation3], 0  ;;  %s2679_s0 = inlined_call_operand.hbm [shape: f32[2,8,32], index: 0, kind: input, shape index: {}]   ;;  %s2680_s1 = inlined_call_operand.hbm [shape: f32[2,8,24], index: 1, kind: input, shape index: {}]   ;;  %s2681_s2 = inlined_call_operand.hbm [shape: f32[2,8,8], index: 2, kind: input, shape index: {}]   ;;  %s2682_s3 = inlined_call_operand.hbm [shape: f32[32,128], index: 3, kind: input, shape index: {}]   ;;  %s2683_s4 = inlined_call_operand.vmem [shape: f32[1,128], index: 4, kind: input, shape index: {}]   ;;  %s2684_s5 = inlined_call_operand.hbm [shape: f32[24,160], index: 5, kind: input, shape index: {}]   ;;  %s2685_s6 = inlined_call_operand.vmem [shape: f32[1,160], index: 6, kind: input, shape index: {}]   ;;  %s2686_s7 = inlined_call_operand.hbm [shape: f32[32,32], index: 7, kind: input, shape index: {}]   ;;  %s2687_s8 = inlined_call_operand.vmem [shape: f32[1,32], index: 8, kind: input, shape index: {}]   ;;  %s2688_s9 = inlined_call_operand.hbm [shape: f32[2,8,32], index: 9, kind: output, shape index: {0}]   ;;  %s2689_s10 = inlined_call_operand.hbm [shape: f32[2,4,8,8], index: 10, kind: output, shape index: {1}]  }
   0x1   :  { %17 = vsyncpa [#allocation6], 0 }
   0x2   :  { %18 = vsyncpa [#allocation9], 0 }
   0x3   :  { %19 = vsyncpa [#allocation12], 0 }
   0x4   :  { %20 = vsyncpa [#allocation4], 0 }
   0x5   :  { %21 = vsyncpa [#allocation15], 0  ;;  %s2268_s13 = smov [#allocation5]   ;;  %s2269_s15 = smov [#allocation8]  }
   0x6   :  { %s39_s14 = sshll.u32 %s2268_s13, 4  ;;  %s63_s16 = sshll.u32 %s2269_s15, 4  ;;  %s40_s14 = int_to_ptr.vmem [resolvable:$true] %s39_s14  ;;  %s2344_s16 = int_to_ptr.vmem [resolvable:$true] %s63_s16 }
   0x7   :  { %s2080_s19 = scalar_lea.hbm %s2680_s1, 256 }
   0x8   :  { %p2081_p0 = scmp.ne.s32.totalorder %s2680_s1, %s2080_s19  ;;  %p2084_p1 = scmp.lt.u32.totalorder %s2080_s19, %s2680_s1 }
   0xa   :  { %p2086_p2 = pnand %p2084_p1, %p2081_p0 }
   0xc   :  { %2089 = shalt.err (!%p2086_p2)
}
   0xd   :  { %s2090_s24 = scalar_lea.vmem %s40_s14, 256  ;;  %p2095_p4 = scmp.lt.s32.totalorder %s40_s14, %s40_s14 }
   0xe   :  { %p2091_p3 = scmp.ne.s32.totalorder %s40_s14, %s2090_s24  ;;  %p2096_p5 = scmp.lt.s32.totalorder %s2090_s24, %s2090_s24 }
  0x10   :  { %p2097_p6 = por %p2096_p5, %p2095_p4 }
  0x12   :  { %p2098_p7 = pnand %p2097_p6, %p2091_p3 }
  0x14   :  { %2101 = shalt.err (!%p2098_p7)
}
  0x15   :  { %s2270_s25 = smov 128   ;;  %s2271_s26 = smov 8  }
  0x16   :  { %45 = dma.hbm_to_vmem [thread:$0]  %s2680_s1, 256, %s40_s14, [#allocation6], %s2270_s25, %s2270_s25, %s2271_s26  }
  0x17   :  { %s2102_s11 = scalar_lea.hbm %s2682_s3, 512 }
  0x18   :  { %p2103_p8 = scmp.ne.s32.totalorder %s2682_s3, %s2102_s11  ;;  %p2106_p9 = scmp.lt.u32.totalorder %s2102_s11, %s2682_s3 }
  0x1a   :  { %p2108_p10 = pnand %p2106_p9, %p2103_p8 }
  0x1c   :  { %2111 = shalt.err (!%p2108_p10)
}
  0x1d   :  { %s2112_s18 = scalar_lea.vmem %s2344_s16, 512  ;;  %p2117_p12 = scmp.lt.s32.totalorder %s2344_s16, %s2344_s16 }
  0x1e   :  { %p2113_p11 = scmp.ne.s32.totalorder %s2344_s16, %s2112_s18  ;;  %p2118_p13 = scmp.lt.s32.totalorder %s2112_s18, %s2112_s18 }
  0x20   :  { %p2119_p0 = por %p2118_p13, %p2117_p12 }
  0x22   :  { %p2120_p1 = pnand %p2119_p0, %p2113_p11 }
  0x24   :  { %2123 = shalt.err (!%p2120_p1)
}
  0x25   :  { %69 = dma.hbm_to_vmem [thread:$0]  %s2682_s3, 512, %s2344_s16, [#allocation9], %s2270_s25, %s2270_s25, %s2271_s26  }
  0x26   :  { %s2272_s19 = smov [#allocation2]   ;;  %s2273_s21 = smov [#allocation7]  }
  0x27   :  { %s27_s20 = sshll.u32 %s2272_s19, 4  ;;  %s51_s22 = sshll.u32 %s2273_s21, 4  ;;  %s28_s20 = int_to_ptr.vmem [resolvable:$true] %s27_s20  ;;  %s2381_s22 = int_to_ptr.vmem [resolvable:$true] %s51_s22 }
  0x28   :  { %s2124_s27 = scalar_lea.hbm %s2679_s0, 256 }
  0x29   :  { %p2125_p2 = scmp.ne.s32.totalorder %s2679_s0, %s2124_s27  ;;  %p2128_p3 = scmp.lt.u32.totalorder %s2124_s27, %s2679_s0 }
  0x2b   :  { %p2130_p4 = pnand %p2128_p3, %p2125_p2 }
  0x2d   :  { %2133 = shalt.err (!%p2130_p4)
}
  0x2e   :  { %s2134_s3 = scalar_lea.vmem %s28_s20, 256  ;;  %p2139_p6 = scmp.lt.s32.totalorder %s28_s20, %s28_s20 }
  0x2f   :  { %p2135_p5 = scmp.ne.s32.totalorder %s28_s20, %s2134_s3  ;;  %p2140_p7 = scmp.lt.s32.totalorder %s2134_s3, %s2134_s3 }
  0x31   :  { %p2141_p8 = por %p2140_p7, %p2139_p6 }
  0x33   :  { %p2142_p9 = pnand %p2141_p8, %p2135_p5 }
  0x35   :  { %2145 = shalt.err (!%p2142_p9)
}
  0x36   :  { %33 = dma.hbm_to_vmem [thread:$0]  %s2679_s0, 256, %s28_s20, [#allocation3], %s2270_s25, %s2270_s25, %s2271_s26  }
  0x37   :  { %s2146_s17 = scalar_lea.hbm %s2681_s2, 256 }
  0x38   :  { %p2147_p10 = scmp.ne.s32.totalorder %s2681_s2, %s2146_s17  ;;  %p2150_p11 = scmp.lt.u32.totalorder %s2146_s17, %s2681_s2 }
  0x3a   :  { %p2152_p12 = pnand %p2150_p11, %p2147_p10 }
  0x3c   :  { %2155 = shalt.err (!%p2152_p12)
}
  0x3d   :  { %s2156_s21 = scalar_lea.vmem %s2381_s22, 256  ;;  %p2161_p0 = scmp.lt.s32.totalorder %s2381_s22, %s2381_s22 }
  0x3e   :  { %p2157_p13 = scmp.ne.s32.totalorder %s2381_s22, %s2156_s21  ;;  %p2162_p1 = scmp.lt.s32.totalorder %s2156_s21, %s2156_s21 }
  0x40   :  { %p2163_p2 = por %p2162_p1, %p2161_p0 }
  0x42   :  { %p2164_p3 = pnand %p2163_p2, %p2157_p13 }
  0x44   :  { %2167 = shalt.err (!%p2164_p3)
}
  0x45   :  { %57 = dma.hbm_to_vmem [thread:$0]  %s2681_s2, 256, %s2381_s22, [#allocation6], %s2270_s25, %s2270_s25, %s2271_s26  }
  0x46   :  { %s2274_s23 = smov [#allocation10]   ;;  %s2168_s29 = scalar_lea.hbm %s2684_s5, 768 }
  0x47   :  { %s77_s24 = sshll.u32 %s2274_s23, 4  ;;  %p2169_p4 = scmp.ne.s32.totalorder %s2684_s5, %s2168_s29  ;;  %s78_s24 = int_to_ptr.vmem [resolvable:$true] %s77_s24 }
  0x48   :  { %p2172_p5 = scmp.lt.u32.totalorder %s2168_s29, %s2684_s5 }
  0x4a   :  { %p2174_p6 = pnand %p2172_p5, %p2169_p4 }
  0x4c   :  { %2177 = shalt.err (!%p2174_p6)
}
  0x4d   :  { %s2178_s12 = scalar_lea.vmem %s78_s24, 768  ;;  %p2183_p8 = scmp.lt.s32.totalorder %s78_s24, %s78_s24 }
  0x4e   :  { %p2179_p7 = scmp.ne.s32.totalorder %s78_s24, %s2178_s12  ;;  %p2184_p9 = scmp.lt.s32.totalorder %s2178_s12, %s2178_s12 }
  0x50   :  { %p2185_p10 = por %p2184_p9, %p2183_p8 }
  0x52   :  { %p2186_p11 = pnand %p2185_p10, %p2179_p7 }
  0x54   :  { %2189 = shalt.err (!%p2186_p11)
}
  0x55   :  { %s2275_s2 = smov 256   ;;  %s2276_s22 = smov 16  }
  0x56   :  { %83 = dma.hbm_to_vmem [thread:$0]  %s2684_s5, 768, %s78_s24, [#allocation9], %s2275_s2, %s2275_s2, %s2276_s22  }
  0x57   :  { %s2277_s17 = smov [#allocation11]   ;;  %s2190_s19 = scalar_lea.hbm %s2686_s7, 512 }
  0x58   :  { %s91_s18 = sshll.u32 %s2277_s17, 4  ;;  %p2191_p12 = scmp.ne.s32.totalorder %s2686_s7, %s2190_s19  ;;  %s92_s18 = int_to_ptr.vmem [resolvable:$true] %s91_s18 }
  0x59   :  { %p2194_p13 = scmp.lt.u32.totalorder %s2190_s19, %s2686_s7 }
  0x5b   :  { %p2196_p0 = pnand %p2194_p13, %p2191_p12 }
  0x5d   :  { %2199 = shalt.err (!%p2196_p0)
}
  0x5e   :  { %s2200_s27 = scalar_lea.vmem %s92_s18, 512  ;;  %p2205_p2 = scmp.lt.s32.totalorder %s92_s18, %s92_s18 }
  0x5f   :  { %p2201_p1 = scmp.ne.s32.totalorder %s92_s18, %s2200_s27  ;;  %p2206_p3 = scmp.lt.s32.totalorder %s2200_s27, %s2200_s27 }
  0x61   :  { %p2207_p4 = por %p2206_p3, %p2205_p2 }
  0x63   :  { %p2208_p5 = pnand %p2207_p4, %p2201_p1 }
  0x65   :  { %2211 = shalt.err (!%p2208_p5)
}
  0x66   :  { %97 = dma.hbm_to_vmem [thread:$0]  %s2686_s7, 512, %s92_s18, [#allocation12], %s2270_s25, %s2270_s25, %s2271_s26  }
  0x67   :  { %2256 = dma.done.wait [#allocation3], 256  }
  0x68   :  { %2257 = vsyncadd [#allocation3], 4294967040 }
  0x69   :  { %2258 = dma.done.wait [#allocation6], 512  }
  0x6a   :  { %2259 = vsyncadd [#allocation6], 4294966784 }
  0x6b   :  { %2260 = dma.done.wait [#allocation9], 1280  }
  0x6c   :  { %2261 = vsyncadd [#allocation9], 4294966016 }
  0x6d   :  { %2262 = dma.done.wait [#allocation12], 512  }
  0x6e   :  { %2263 = vsyncadd [#allocation12], 4294966784  ;;  %v2278_v0 = vmov 0.0   ;;  %v122_v1 = vld [vmem:[#allocation8] sm:$0xff]  ;;  %v123_v2 = vld [vmem:[#allocation8 + $0x8] sm:$0xff]  ;;  %vm133_vm0 = vcmask 261120   ;;  %v223_v19 = vlaneseq }
  0x6f   :  { %304 = vmatprep.mubr.f32.mxu1 %v2278_v0  ;;  %v216_v3 = vld [vmem:[#allocation10 + $0x8] sm:$0xff]  ;;  %v2007_v4 = vpack.c.bf16 %v123_v2, %v122_v1  ;;  %v218_v5 = vld [vmem:[#allocation10 + $0x18] sm:$0xff]  ;;  %v215_v6 = vld [vmem:[#allocation10] sm:$0xff]  ;;  %vm233_vm1 = vcmask 195584   ;;  %vm2279_vm2 = vmmov 0   ;;  %vm325_vm4 = vcmask 64512  }
  0x70   :  { %v217_v7 = vld [vmem:[#allocation10 + $0x10] sm:$0xff]  ;;  %v2015_v8 = vpack.c.bf16 %v218_v5, %v216_v3  ;;  %v125_v11 = vld [vmem:[#allocation8 + $0x18] sm:$0xff]  ;;  %v220_v13 = vld [vmem:[#allocation10 + $0x28] sm:$0xff]  ;;  %v224_v20 = vshrl.u32 %v223_v19, 7  ;;  %s2282_s11 = smov 64   ;;  %s2283_s3 = smov 112  }
  0x71   :  { %v2017_v9 = vpack.c.bf16 %v217_v7, %v215_v6  ;;  %v124_v10 = vld [vmem:[#allocation8 + $0x10] sm:$0xff]  ;;  %2008 = vmatprep.subr.bf16.mxu0 %v2007_v4  ;;  %v219_v15 = vld [vmem:[#allocation10 + $0x20] sm:$0xff]  ;;  %v119_v17 = vld [vmem:[#allocation2 + $0x8] sm:$0xff]  ;;  %s2284_s16 = smov 32   ;;  %s2285_s12 = smov 104   ;;  %vm1680_vm8 = vcmask 130048  }
  0x72   :  { %v2011_v12 = vpack.c.bf16 %v125_v11, %v124_v10  ;;  %v118_v14 = vld [vmem:[#allocation2] sm:$0xff]  ;;  %2016 = vmatprep.subr.bf16.mxu1 %v2015_v8  ;;  %2010 = vmatpush3.bf16.msra.mxu0 %v2007_v4  ;;  %v120_v16 = vld [vmem:[#allocation5] sm:$0xff]  ;;  %v121_v18 = vld [vmem:[#allocation5 + $0x8] sm:$0xff]  ;;  %v225_v21 = vsub.s32 0, %v224_v20  ;;  %v229_v23 = vsub.s32 1, %v224_v20  ;;  %s2286_s2 = smov 24  }
  0x73   :  { %2018 = vmatpush1.bf16.msra.mxu1 %v2017_v9  ;;  %1913 = vmatprep.mubr.msk.f32.mxu0 %vm133_vm0, %v118_v14  ;;  %v221_v22 = vld [vmem:[%s2685_s6] sm:$0x3]  ;;  %v2501_v40 = vld [vmem:[#allocation7 + $0x8] sm:$0xff]  ;;  %s2281_s6 = smov 120  }
  0x74   :  { %2012 = vmatprep.subr.bf16.mxu0 %v2011_v12  ;;  %244 = vmatprep.subr.mxu1 %v220_v13  ;;  %v226_v24 = vrot.slane %v221_v22, %v225_v21  ;;  %v230_v25 = vrot.slane %v221_v22, %v229_v23  ;;  %v1829_v27 = vld [vmem:[%s2683_s4] ss:$0 sm:$0xff]  ;;  %s2280_s4 = smov 96   ;;  %vm320_vm5 = vcmp.eq.f32.partialorder %v2501_v40, 0.0  ;;  %vm322_vm7 = vcmp.ne.f32.partialorder %v2501_v40, 0.0 }
  0x75   :  { %v2498_v39 = vld [vmem:[#allocation7] sm:$0xff] }
  0x76   :  { %2014 = vmatpush3.bf16.msra.mxu0 %v2011_v12  ;;  %vm319_vm3 = vcmp.eq.f32.partialorder %v2498_v39, 0.0  ;;  %vm321_vm6 = vcmp.ne.f32.partialorder %v2498_v39, 0.0 }
  0x77   :  { %245 = vmatpush1.msra.mxu1 %v219_v15  ;;  %1926 = vmatprep.subr.mxu0 %v2278_v0 }
  0x78   :  { %1832 = vmatmul.mubr.msk.f32.vlgmr.msra.gmra.mrb[0].mxu1 %vm233_vm1, %v120_v16  ;;  %1916 = vmatprep.subr.mxu1 %v2278_v0 }
  0x79   :  { %1914 = vmatmul.mubr.msk.f32.vlgmr.msra.gmra.mrb[0].mxu0 %vm133_vm0, %v119_v17  ;;  %310 = vmatprep.mubr.f32.mxu1 %v2278_v0 }
  0x7a   :  { %1928 = vmatprep.mubr.msk.f32.mxu0 %vm2279_vm2, %v2278_v0 }
  0x7c   :  { %1833 = vmatmul.mubr.msk.f32.gmra.mrb[2].mxu1 %vm233_vm1, %v121_v18 }
  0x7d   :  { %1918 = vmatprep.mubr.msk.f32.mxu1 %vm2279_vm2, %v2278_v0 }
 0x14b   :  { %v306_v26 = vpop.f32.mrb[0].mxu1 }
 0x14c   :  { %v2464_v28 = vadd.f32 %v306_v26, %v226_v24  ;;  %v308_v29 = vpop.f32.mrb[1].mxu1  ;;  %v1915_v30 = vpop.f32.mrb[0].mxu0 }
 0x14d   :  { %v2466_v31 = vadd.f32 %v308_v29, %v230_v25  ;;  %v206_v32 = vpop.f32.mrb[1].mxu0  ;;  %v2483_v37 = vadd.f32 %v1915_v30, %v1829_v27 }
 0x14e   :  { %v2468_v33 = vadd.f32 %v1829_v27, %v206_v32  ;;  %1917 = vmatpush3.xpose.msk.msra.mxu1 %vm133_vm0, %v2464_v28 }
 0x14f   :  { %v312_v34 = vpop.f32.mrb[2].mxu1  ;;  %1927 = vmatpush3.msra.mxu0 %v2466_v31  ;;  %1921 = vmatprep.subr.mxu1 %v2278_v0 }
 0x150   :  { %v2474_v35 = vadd.f32 %v312_v34, %v226_v24  ;;  %v314_v36 = vpop.f32.mrb[3].mxu1  ;;  %1936 = vmatprep.subr.mxu0 %v2278_v0 }
 0x151   :  { %1919 = vmatmul.mubr.msk.f32.vlgmr.msra.gmra.mrb[4].mxu1 %vm133_vm0, %v2468_v33  ;;  %v2488_v38 = vadd.f32 %v314_v36, %v230_v25 }
 0x152   :  { %736 = vrot.lane.b32.xlu1 %v2474_v35, %s2280_s4  ;;  %1922 = vmatpush3.xpose.msk.msra.mxu1 %vm133_vm0, %v2474_v35 }
 0x153   :  { %1923 = vmatprep.mubr.msk.f32.mxu1 %vm2279_vm2, %v2278_v0  ;;  %1931 = vmatprep.subr.mxu1 %v2278_v0 }
 0x155   :  { %1924 = vmatmul.mubr.msk.f32.vlgmr.msra.gmra.mrb[6].mxu1 %vm133_vm0, %v2483_v37 }
 0x156   :  { %656 = vrot.lane.b32.xlu1 %v2468_v33, %s2280_s4  ;;  %1932 = vmatpush3.msra.mxu1 %v2488_v38 }
 0x157   :  { %1933 = vmatprep.mubr.msk.f32.mxu1 %vm2279_vm2, %v2278_v0  ;;  %1941 = vmatprep.subr.mxu1 %v2278_v0 }
 0x1c4   :  { %v737_v59 = vpop.permute.xlu1 %736 }
 0x1c8   :  { %v657_v60 = vpop.permute.xlu1 %656 }
 0x224   :  { %v406_v41 = vpop.f32.mrb[4].mxu1 }
 0x225   :  { %v486_v42 = vsel %vm319_vm3, -3.4028235e+38, %v406_v41  ;;  %v1920_v43 = vpop.f32.mrb[5].mxu1 }
 0x226   :  { %v488_v44 = vsel %vm325_vm4, %v486_v42, -inf }
 0x227   :  { %489 = vmax.xlane.f32.xlu0 %v488_v44 }
 0x228   :  { %v482_v45 = vpop.f32.mrb[6].mxu1 }
 0x229   :  { %v487_v46 = vsel %vm320_vm5, -3.4028235e+38, %v482_v45  ;;  %v1925_v47 = vpop.f32.mrb[7].mxu1 }
 0x22a   :  { %v491_v48 = vsel %vm325_vm4, %v487_v46, -inf }
 0x22b   :  { %492 = vmax.xlane.f32.xlu0 %v491_v48 }
 0x241   :  { %658 = vrot.lane.b32.xlu0 %v2464_v28, %s2280_s4 }
 0x2b4   :  { %v490_v49 = vpop.xlane.xlu0 %489 }
 0x2b5   :  { %v494_v50 = vsub.f32 %v486_v42, %v490_v49 }
 0x2b7   :  { %v496_v51 = vmul.f32 1.442695, %v494_v50 }
 0x2b8   :  { %v493_v52 = vpop.xlane.xlu0 %492 }
 0x2b9   :  { %2048 = vpow2.f32 %v496_v51  ;;  %v495_v53 = vsub.f32 %v487_v46, %v493_v52 }
 0x2bb   :  { %v498_v54 = vmul.f32 1.442695, %v495_v53 }
 0x2bc   :  { %v659_v2 = vpop.permute.xlu0 %658 }
 0x2bd   :  { %2050 = vpow2.f32 %v498_v54 }
 0x2c3   :  { %v2049_v55 = vpop.eup %2048 }
 0x2c4   :  { %v500_v56 = vsel %vm325_vm4, %v2049_v55, 0.0 }
 0x2c5   :  { %501 = vadd.xlane.f32.xlu1 %v500_v56 }
 0x2c7   :  { %v2051_v57 = vpop.eup %2050 }
 0x2c8   :  { %v503_v58 = vsel %vm325_vm4, %v2051_v57, 0.0 }
 0x2c9   :  { %504 = vadd.xlane.f32.xlu1 %v503_v58 }
 0x2da   :  { %734 = vrot.lane.b32.xlu1 %v2483_v37, %s2280_s4 }
 0x352   :  { %v502_v61 = vpop.xlane.xlu1 %501 }
 0x353   :  { %2052 = vrcp.f32 %v502_v61 }
 0x356   :  { %v505_v62 = vpop.xlane.xlu1 %504 }
 0x357   :  { %2054 = vrcp.f32 %v505_v62 }
 0x35a   :  { %v735_v5 = vpop.permute.xlu1 %734 }
 0x35d   :  { %v2053_v63 = vpop.eup %2052 }
 0x35e   :  { %v508_v1 = vmul.f32 %v2053_v63, %v2049_v55 }
 0x360   :  { %1785 = vst.msk [vmem:[#allocation14] sm:$0xff] %vm325_vm4, %v508_v1  ;;  %1929 = vmatmul.mubr.msk.f32.vlgmr.msra.gmra.mrb[2].mxu0 %vm325_vm4, %v508_v1 }
 0x361   :  { %v2055_v3 = vpop.eup %2054  ;;  %1937 = vmatpush3.xpose.msk.msra.mxu0 %vm133_vm0, %v659_v2  ;;  %1938 = vmatprep.mubr.msk.f32.mxu0 %vm2279_vm2, %v2278_v0 }
 0x362   :  { %v509_v4 = vmul.f32 %v2055_v3, %v2051_v57  ;;  %1946 = vmatprep.subr.mxu0 %v2278_v0 }
 0x364   :  { %1789 = vst.msk [vmem:[#allocation14 + $0x20] sm:$0xff] %vm325_vm4, %v509_v4  ;;  %1934 = vmatmul.mubr.msk.f32.vlgmr.msra.gmra.mrb[8].mxu1 %vm325_vm4, %v509_v4  ;;  %1939 = vmatmul.mubr.msk.f32.vlgmr.msra.gmra.mrb[4].mxu0 %vm133_vm0, %v657_v60 }
 0x365   :  { %1942 = vmatpush3.xpose.msk.msra.mxu1 %vm133_vm0, %v737_v59  ;;  %1943 = vmatprep.mubr.msk.f32.mxu1 %vm2279_vm2, %v2278_v0 }
 0x366   :  { %1951 = vmatprep.subr.mxu1 %v2278_v0  ;;  %1948 = vmatprep.mubr.msk.f32.mxu0 %vm2279_vm2, %v2278_v0 }
 0x368   :  { %1944 = vmatmul.mubr.msk.f32.vlgmr.msra.gmra.mrb[10].mxu1 %vm133_vm0, %v735_v5 }
 0x369   :  { %1953 = vmatprep.mubr.msk.f32.mxu1 %vm2279_vm2, %v2278_v0 }
 0x433   :  { %v2534_v6 = vpop.f32.mrb[2].mxu0 }
 0x434   :  { %v1930_v7 = vpop.f32.mrb[3].mxu0 }
 0x437   :  { %v2536_v8 = vpop.f32.mrb[8].mxu1  ;;  %v730_v9 = vpop.f32.mrb[4].mxu0 }
 0x438   :  { %v812_v10 = vsel %vm319_vm3, -3.4028235e+38, %v730_v9  ;;  %v1935_v11 = vpop.f32.mrb[9].mxu1  ;;  %v1940_v12 = vpop.f32.mrb[5].mxu0 }
 0x439   :  { %v814_v13 = vsel %vm325_vm4, %v812_v10, -inf }
 0x43a   :  { %815 = vmax.xlane.f32.xlu0 %v814_v13 }
 0x43b   :  { %v808_v14 = vpop.f32.mrb[10].mxu1 }
 0x43c   :  { %v813_v15 = vsel %vm320_vm5, -3.4028235e+38, %v808_v14  ;;  %v1945_v16 = vpop.f32.mrb[11].mxu1 }
 0x43d   :  { %v817_v17 = vsel %vm325_vm4, %v813_v15, -inf }
 0x43e   :  { %818 = vmax.xlane.f32.xlu1 %v817_v17 }
 0x44f   :  { %914 = vrot.lane.b32.xlu1 %v2488_v38, %s2281_s6 }
 0x450   :  { %837 = vrot.lane.b32.xlu0 %v2466_v31, %s2281_s6 }
 0x453   :  { %992 = vrot.lane.b32.xlu1 %v2464_v28, %s2282_s11 }
 0x457   :  { %1070 = vrot.lane.b32.xlu1 %v2474_v35, %s2282_s11 }
 0x45b   :  { %1068 = vrot.lane.b32.xlu1 %v2483_v37, %s2282_s11 }
 0x4c7   :  { %v816_v18 = vpop.xlane.xlu0 %815 }
 0x4c8   :  { %v820_v19 = vsub.f32 %v812_v10, %v816_v18 }
 0x4ca   :  { %v822_v20 = vmul.f32 1.442695, %v820_v19 }
 0x4cb   :  { %v838_v21 = vpop.permute.xlu0 %837  ;;  %v819_v22 = vpop.xlane.xlu1 %818 }
 0x4cc   :  { %2056 = vpow2.f32 %v822_v20  ;;  %v821_v23 = vsub.f32 %v813_v15, %v819_v22  ;;  %1947 = vmatpush3.msra.mxu0 %v838_v21 }
 0x4cd   :  { %1956 = vmatprep.subr.mxu0 %v2278_v0 }
 0x4ce   :  { %v824_v24 = vmul.f32 1.442695, %v821_v23 }
 0x4cf   :  { %v915_v25 = vpop.permute.xlu1 %914 }
 0x4d0   :  { %2058 = vpow2.f32 %v824_v24  ;;  %1952 = vmatpush3.msra.mxu1 %v915_v25 }
 0x4d1   :  { %1961 = vmatprep.subr.mxu1 %v2278_v0 }
 0x4d3   :  { %v993_v36 = vpop.permute.xlu1 %992 }
 0x4d6   :  { %v2057_v26 = vpop.eup %2056 }
 0x4d7   :  { %v826_v27 = vsel %vm325_vm4, %v2057_v26, 0.0  ;;  %v1071_v44 = vpop.permute.xlu1 %1070 }
 0x4d8   :  { %827 = vadd.xlane.f32.xlu0 %v826_v27 }
 0x4da   :  { %v2059_v29 = vpop.eup %2058 }
 0x4db   :  { %v829_v30 = vsel %vm325_vm4, %v2059_v29, 0.0  ;;  %v1069_v47 = vpop.permute.xlu1 %1068 }
 0x4dc   :  { %830 = vadd.xlane.f32.xlu0 %v829_v30 }
 0x4f2   :  { %990 = vrot.lane.b32.xlu0 %v2468_v33, %s2282_s11 }
 0x565   :  { %v828_v32 = vpop.xlane.xlu0 %827 }
 0x566   :  { %2060 = vrcp.f32 %v828_v32 }
 0x569   :  { %v831_v34 = vpop.xlane.xlu0 %830 }
 0x56a   :  { %2062 = vrcp.f32 %v831_v34 }
 0x56d   :  { %v991_v46 = vpop.permute.xlu0 %990 }
 0x570   :  { %v2061_v41 = vpop.eup %2060 }
 0x571   :  { %v834_v42 = vmul.f32 %v2061_v41, %v2057_v26 }
 0x573   :  { %1786 = vst.msk [vmem:[#allocation14 + $0x8] sm:$0xff] %vm325_vm4, %v834_v42  ;;  %1949 = vmatmul.mubr.msk.f32.vlgmr.msra.gmra.mrb[6].mxu0 %vm325_vm4, %v834_v42 }
 0x574   :  { %v2063_v43 = vpop.eup %2062  ;;  %1957 = vmatpush3.xpose.msk.msra.mxu0 %vm133_vm0, %v993_v36  ;;  %1958 = vmatprep.mubr.msk.f32.mxu0 %vm2279_vm2, %v2278_v0 }
 0x575   :  { %v835_v45 = vmul.f32 %v2063_v43, %v2059_v29  ;;  %1966 = vmatprep.subr.mxu0 %v2278_v0 }
 0x577   :  { %1790 = vst.msk [vmem:[#allocation14 + $0x28] sm:$0xff] %vm325_vm4, %v835_v45  ;;  %1954 = vmatmul.mubr.msk.f32.vlgmr.msra.gmra.mrb[12].mxu1 %vm325_vm4, %v835_v45  ;;  %1959 = vmatmul.mubr.msk.f32.vlgmr.msra.gmra.mrb[8].mxu0 %vm133_vm0, %v991_v46 }
 0x578   :  { %1962 = vmatpush3.xpose.msk.msra.mxu1 %vm133_vm0, %v1071_v44  ;;  %1963 = vmatprep.mubr.msk.f32.mxu1 %vm2279_vm2, %v2278_v0 }
 0x579   :  { %1971 = vmatprep.subr.mxu1 %v2278_v0  ;;  %1968 = vmatprep.mubr.msk.f32.mxu0 %vm2279_vm2, %v2278_v0 }
 0x57b   :  { %1964 = vmatmul.mubr.msk.f32.vlgmr.msra.gmra.mrb[14].mxu1 %vm133_vm0, %v1069_v47 }
 0x57c   :  { %1973 = vmatprep.mubr.msk.f32.mxu1 %vm2279_vm2, %v2278_v0 }
 0x646   :  { %v2572_v48 = vpop.f32.mrb[6].mxu0 }
 0x647   :  { %v1950_v49 = vpop.f32.mrb[7].mxu0 }
 0x64a   :  { %v2574_v50 = vpop.f32.mrb[12].mxu1  ;;  %v1064_v51 = vpop.f32.mrb[8].mxu0 }
 0x64b   :  { %v1146_v52 = vsel %vm319_vm3, -3.4028235e+38, %v1064_v51  ;;  %v1955_v53 = vpop.f32.mrb[13].mxu1  ;;  %v1960_v54 = vpop.f32.mrb[9].mxu0 }
 0x64c   :  { %v1148_v55 = vsel %vm325_vm4, %v1146_v52, -inf  ;;  %v1686_v54 = vld [vmem:[#allocation11 + $0x8] sm:$0xff] }
 0x64d   :  { %1149 = vmax.xlane.f32.xlu0 %v1148_v55 }
 0x64e   :  { %v1142_v56 = vpop.f32.mrb[14].mxu1 }
 0x64f   :  { %v1147_v57 = vsel %vm320_vm5, -3.4028235e+38, %v1142_v56  ;;  %v1965_v58 = vpop.f32.mrb[15].mxu1  ;;  %v1687_v56 = vld [vmem:[#allocation11 + $0x10] sm:$0xff] }
 0x650   :  { %v1151_v59 = vsel %vm325_vm4, %v1147_v57, -inf }
 0x651   :  { %1152 = vmax.xlane.f32.xlu1 %v1151_v59 }
 0x662   :  { %1246 = vrot.lane.b32.xlu1 %v2488_v38, %s2283_s3 }
 0x663   :  { %1170 = vrot.lane.b32.xlu0 %v2466_v31, %s2283_s3 }
 0x666   :  { %1324 = vrot.lane.b32.xlu1 %v2464_v28, %s2284_s16 }
 0x66a   :  { %1402 = vrot.lane.b32.xlu1 %v2474_v35, %s2284_s16 }
 0x66e   :  { %1400 = vrot.lane.b32.xlu1 %v2483_v37, %s2284_s16 }
 0x6da   :  { %v1150_v60 = vpop.xlane.xlu0 %1149 }
 0x6db   :  { %v1154_v61 = vsub.f32 %v1146_v52, %v1150_v60 }
 0x6dd   :  { %v1156_v62 = vmul.f32 1.442695, %v1154_v61 }
 0x6de   :  { %v1171_v63 = vpop.permute.xlu0 %1170  ;;  %v1153_v1 = vpop.xlane.xlu1 %1152 }
 0x6df   :  { %2064 = vpow2.f32 %v1156_v62  ;;  %v1155_v2 = vsub.f32 %v1147_v57, %v1153_v1  ;;  %1967 = vmatpush3.msra.mxu0 %v1171_v63  ;;  %v1688_v57 = vld [vmem:[#allocation11 + $0x18] sm:$0xff]  ;;  %v323_v63 = vsel %vm321_vm6, 1.0, %v2278_v0 }
 0x6e0   :  { %1976 = vmatprep.subr.mxu0 %v2278_v0  ;;  %v2023_v58 = vpack.c.bf16 %v1688_v57, %v1687_v56  ;;  %v326_v1 = vsel %vm325_vm4, %v323_v63, -inf }
 0x6e1   :  { %v1158_v3 = vmul.f32 1.442695, %v1155_v2  ;;  %v324_v2 = vsel %vm322_vm7, 1.0, %v2278_v0 }
 0x6e2   :  { %v1247_v4 = vpop.permute.xlu1 %1246 }
 0x6e3   :  { %2066 = vpow2.f32 %v1158_v3  ;;  %1972 = vmatpush3.msra.mxu1 %v1247_v4  ;;  %v329_v3 = vsel %vm325_vm4, %v324_v2, -inf }
 0x6e4   :  { %1981 = vmatprep.subr.mxu1 %v2278_v0 }
 0x6e6   :  { %v1325_v10 = vpop.permute.xlu1 %1324 }
 0x6e9   :  { %v2065_v28 = vpop.eup %2064 }
 0x6ea   :  { %v1160_v35 = vsel %vm325_vm4, %v2065_v28, 0.0  ;;  %v1403_v14 = vpop.permute.xlu1 %1402 }
 0x6eb   :  { %1161 = vadd.xlane.f32.xlu0 %v1160_v35 }
 0x6ed   :  { %v2067_v37 = vpop.eup %2066 }
 0x6ee   :  { %v1163_v5 = vsel %vm325_vm4, %v2067_v37, 0.0  ;;  %v1401_v16 = vpop.permute.xlu1 %1400 }
 0x6ef   :  { %1164 = vadd.xlane.f32.xlu0 %v1163_v5 }
 0x705   :  { %1322 = vrot.lane.b32.xlu0 %v2468_v33, %s2284_s16 }
 0x778   :  { %v1162_v7 = vpop.xlane.xlu0 %1161 }
 0x779   :  { %2068 = vrcp.f32 %v1162_v7 }
 0x77c   :  { %v1165_v9 = vpop.xlane.xlu0 %1164 }
 0x77d   :  { %2070 = vrcp.f32 %v1165_v9 }
 0x780   :  { %v1323_v33 = vpop.permute.xlu0 %1322 }
 0x783   :  { %v2069_v11 = vpop.eup %2068 }
 0x784   :  { %v1168_v12 = vmul.f32 %v2069_v11, %v2065_v28 }
 0x786   :  { %1787 = vst.msk [vmem:[#allocation14 + $0x10] sm:$0xff] %vm325_vm4, %v1168_v12  ;;  %1969 = vmatmul.mubr.msk.f32.vlgmr.msra.gmra.mrb[10].mxu0 %vm325_vm4, %v1168_v12 }
 0x787   :  { %v2071_v13 = vpop.eup %2070  ;;  %1977 = vmatpush3.xpose.msk.msra.mxu0 %vm133_vm0, %v1325_v10  ;;  %1978 = vmatprep.mubr.msk.f32.mxu0 %vm2279_vm2, %v2278_v0 }
 0x788   :  { %v1169_v15 = vmul.f32 %v2071_v13, %v2067_v37  ;;  %1986 = vmatprep.subr.mxu0 %v2278_v0 }
 0x78a   :  { %1791 = vst.msk [vmem:[#allocation14 + $0x30] sm:$0xff] %vm325_vm4, %v1169_v15  ;;  %1974 = vmatmul.mubr.msk.f32.vlgmr.msra.gmra.mrb[16].mxu1 %vm325_vm4, %v1169_v15  ;;  %1979 = vmatmul.mubr.msk.f32.vlgmr.msra.gmra.mrb[12].mxu0 %vm133_vm0, %v1323_v33 }
 0x78b   :  { %1982 = vmatpush3.xpose.msk.msra.mxu1 %vm133_vm0, %v1403_v14  ;;  %1983 = vmatprep.mubr.msk.f32.mxu1 %vm2279_vm2, %v2278_v0 }
 0x78c   :  { %1991 = vmatprep.subr.mxu1 %v2278_v0  ;;  %1988 = vmatprep.mubr.msk.f32.mxu0 %vm2279_vm2, %v2278_v0 }
 0x78e   :  { %1984 = vmatmul.mubr.msk.f32.vlgmr.msra.gmra.mrb[18].mxu1 %vm133_vm0, %v1401_v16 }
 0x78f   :  { %1993 = vmatprep.mubr.msk.f32.mxu1 %vm2279_vm2, %v2278_v0 }
 0x859   :  { %v1242_v17 = vpop.f32.mrb[10].mxu0 }
 0x85a   :  { %v1970_v18 = vpop.f32.mrb[11].mxu0 }
 0x85d   :  { %v1318_v19 = vpop.f32.mrb[16].mxu1  ;;  %v1396_v20 = vpop.f32.mrb[12].mxu0 }
 0x85e   :  { %v1478_v21 = vsel %vm319_vm3, -3.4028235e+38, %v1396_v20  ;;  %v1975_v22 = vpop.f32.mrb[17].mxu1  ;;  %v1980_v23 = vpop.f32.mrb[13].mxu0 }
 0x85f   :  { %v1480_v24 = vsel %vm325_vm4, %v1478_v21, -inf }
 0x860   :  { %1481 = vmax.xlane.f32.xlu0 %v1480_v24 }
 0x861   :  { %v1474_v25 = vpop.f32.mrb[18].mxu1 }
 0x862   :  { %v1479_v26 = vsel %vm320_vm5, -3.4028235e+38, %v1474_v25  ;;  %v1985_v27 = vpop.f32.mrb[19].mxu1 }
 0x863   :  { %v1483_v29 = vsel %vm325_vm4, %v1479_v26, -inf }
 0x864   :  { %1484 = vmax.xlane.f32.xlu1 %v1483_v29 }
 0x875   :  { %1578 = vrot.lane.b32.xlu1 %v2488_v38, %s2285_s12 }
 0x879   :  { %1656 = vrot.lane.b32.xlu1 %v2572_v48, %s2271_s26 }
 0x87d   :  { %1658 = vrot.lane.b32.xlu1 %v2574_v50, %s2271_s26 }
 0x881   :  { %1666 = vrot.lane.b32.xlu1 %v1318_v19, %s2276_s22 }
 0x8ed   :  { %v1482_v30 = vpop.xlane.xlu0 %1481 }
 0x8ee   :  { %v1486_v32 = vsub.f32 %v1478_v21, %v1482_v30 }
 0x8f0   :  { %v1488_v34 = vmul.f32 1.442695, %v1486_v32 }
 0x8f1   :  { %v1485_v36 = vpop.xlane.xlu1 %1484 }
 0x8f2   :  { %2072 = vpow2.f32 %v1488_v34  ;;  %v1487_v41 = vsub.f32 %v1479_v26, %v1485_v36 }
 0x8f4   :  { %v1490_v42 = vmul.f32 1.442695, %v1487_v41 }
 0x8f5   :  { %v1579_v43 = vpop.permute.xlu1 %1578 }
 0x8f6   :  { %2074 = vpow2.f32 %v1490_v42  ;;  %1992 = vmatpush3.msra.mxu1 %v1579_v43 }
 0x8f9   :  { %v1657_v4 = vpop.permute.xlu1 %1656 }
 0x8fa   :  { %v1678_v37 = vsel %vm325_vm4, %v2534_v6, %v1657_v4 }
 0x8fc   :  { %v2073_v44 = vpop.eup %2072 }
 0x8fd   :  { %v1492_v38 = vsel %vm325_vm4, %v2073_v44, 0.0  ;;  %v1659_v28 = vpop.permute.xlu1 %1658 }
 0x8fe   :  { %1493 = vadd.xlane.f32.xlu0 %v1492_v38  ;;  %v1679_v0 = vsel %vm325_vm4, %v2536_v8, %v1659_v28 }
 0x900   :  { %v2075_v45 = vpop.eup %2074 }
 0x901   :  { %v1495_v46 = vsel %vm325_vm4, %v2075_v45, 0.0  ;;  %v1667_v39 = vpop.permute.xlu1 %1666 }
 0x902   :  { %1496 = vadd.xlane.f32.xlu0 %v1495_v46  ;;  %v1682_v40 = vsel %vm1680_vm8, %v1679_v0, %v1667_v39 }
 0x918   :  { %1502 = vrot.lane.b32.xlu0 %v2466_v31, %s2285_s12  ;;  %v1685_v31 = vld [vmem:[#allocation11] sm:$0xff] }
 0x919   :  { %v2019_v55 = vpack.c.bf16 %v1686_v54, %v1685_v31 }
 0x91c   :  { %1664 = vrot.lane.b32.xlu0 %v1242_v17, %s2276_s22  ;;  %s2287_s22 = smov [#allocation14]  }
 0x91d   :  { %s1810_s13 = sshll.u32 %s2287_s22, 4  ;;  %s1811_s13 = int_to_ptr.vmem [resolvable:$true] %s1810_s13 }
 0x91e   :  { %s2212_s15 = scalar_lea.vmem %s1811_s13, 1024  ;;  %p2217_p7 = scmp.lt.s32.totalorder %s1811_s13, %s1811_s13 }
 0x91f   :  { %p2213_p6 = scmp.ne.s32.totalorder %s1811_s13, %s2212_s15  ;;  %p2218_p8 = scmp.lt.s32.totalorder %s2212_s15, %s2212_s15 }
 0x921   :  { %p2219_p9 = por %p2218_p8, %p2217_p7 }
 0x923   :  { %p2220_p10 = pnand %p2219_p9, %p2213_p6 }
 0x98b   :  { %v1494_v47 = vpop.xlane.xlu0 %1493 }
 0x98c   :  { %2076 = vrcp.f32 %v1494_v47 }
 0x98f   :  { %v1497_v48 = vpop.xlane.xlu0 %1496 }
 0x990   :  { %2078 = vrcp.f32 %v1497_v48 }
 0x993   :  { %v1503_v49 = vpop.permute.xlu0 %1502 }
 0x994   :  { %1987 = vmatpush3.msra.mxu0 %v1503_v49 }
 0x995   :  { %2020 = vmatprep.subr.bf16.mxu0 %v2019_v55 }
 0x996   :  { %v2077_v50 = vpop.eup %2076 }
 0x997   :  { %v1500_v51 = vmul.f32 %v2077_v50, %v2073_v44  ;;  %v1665_v35 = vpop.permute.xlu0 %1664 }
 0x998   :  { %v1681_v5 = vsel %vm1680_vm8, %v1678_v37, %v1665_v35 }
 0x999   :  { %1788 = vst.msk [vmem:[#allocation14 + $0x18] sm:$0xff] %vm325_vm4, %v1500_v51  ;;  %1989 = vmatmul.mubr.msk.f32.vlgmr.msra.gmra.mrb[14].mxu0 %vm325_vm4, %v1500_v51 }
 0x99a   :  { %v2079_v52 = vpop.eup %2078  ;;  %2022 = vmatpush3.bf16.msra.mxu0 %v2019_v55 }
 0x99b   :  { %v1501_v53 = vmul.f32 %v2079_v52, %v2075_v45  ;;  %2024 = vmatprep.subr.bf16.mxu0 %v2023_v58 }
 0x99d   :  { %1792 = vst.msk [vmem:[#allocation14 + $0x38] sm:$0xff] %vm325_vm4, %v1501_v53  ;;  %1994 = vmatmul.mubr.msk.f32.vlgmr.msra.gmra.mrb[20].mxu1 %vm325_vm4, %v1501_v53 }
 0x99e   :  { %2026 = vmatpush3.bf16.msra.mxu0 %v2023_v58 }
 0xa6c   :  { %v1574_v59 = vpop.f32.mrb[14].mxu0 }
 0xa6d   :  { %1672 = vrot.lane.b32.xlu0 %v1574_v59, %s2286_s2  ;;  %v1990_v60 = vpop.f32.mrb[15].mxu0 }
 0xa70   :  { %v1650_v61 = vpop.f32.mrb[20].mxu1 }
 0xa71   :  { %1674 = vrot.lane.b32.xlu1 %v1650_v61, %s2286_s2  ;;  %v1995_v62 = vpop.f32.mrb[21].mxu1 }
 0xa8c   :  { %327 = vmax.xlane.f32.xlu0 %v326_v1 }
 0xa95   :  { %330 = vmax.xlane.f32.xlu1 %v329_v3 }
 0xadf   :  { %v1673_v7 = vpop.permute.xlu0 %1672 }
 0xae0   :  { %v1683_v9 = vsel %vm233_vm1, %v1681_v5, %v1673_v7 }
 0xae1   :  { %2004 = vmatprep.mubr.msk.f32.mxu0 %vm133_vm0, %v1683_v9 }
 0xae3   :  { %v1675_v10 = vpop.permute.xlu1 %1674 }
 0xae4   :  { %v1684_v11 = vsel %vm233_vm1, %v1682_v40, %v1675_v10 }
 0xae5   :  { %2005 = vmatmul.mubr.msk.f32.vlgmr.msra.gmra.mrb[16].mxu0 %vm133_vm0, %v1684_v11 }
 0xae6   :  { %2223 = shalt.err (!%p2220_p10)
}
 0xae7   :  { %s2224_s1 = scalar_lea.hbm %s2689_s10, 1024 }
 0xae8   :  { %p2225_p11 = scmp.ne.s32.totalorder %s2689_s10, %s2224_s1  ;;  %p2228_p12 = scmp.lt.u32.totalorder %s2224_s1, %s2689_s10 }
 0xaea   :  { %p2230_p13 = pnand %p2228_p12, %p2225_p11 }
 0xaec   :  { %2233 = shalt.err (!%p2230_p13)
}
 0xaed   :  { %1816 = dma.vmem_to_hbm [thread:$0]  %s1811_s13, 1024, %s2689_s10, [#allocation15], %s2270_s25, %s2270_s25, %s2271_s26  }
 0xaee   :  { %v1858_v8 = vld [vmem:[%s2687_s8] ss:$0 sm:$0xff]  ;;  %s2288_s24 = smov [#allocation13]  }
 0xaef   :  { %s1798_s7 = sshll.u32 %s2288_s24, 4  ;;  %s1799_s7 = int_to_ptr.vmem [resolvable:$true] %s1798_s7 }
 0xaf0   :  { %s2234_s10 = scalar_lea.vmem %s1799_s7, 256  ;;  %p2239_p1 = scmp.lt.s32.totalorder %s1799_s7, %s1799_s7 }
 0xaf1   :  { %p2235_p0 = scmp.ne.s32.totalorder %s1799_s7, %s2234_s10  ;;  %p2240_p2 = scmp.lt.s32.totalorder %s2234_s10, %s2234_s10 }
 0xaf3   :  { %p2241_p3 = por %p2240_p2, %p2239_p1 }
 0xaf5   :  { %p2242_p4 = pnand %p2241_p3, %p2235_p0 }
 0xb19   :  { %v328_v12 = vpop.xlane.xlu0 %327 }
 0xb1a   :  { %vm332_vm10 = vcmp.gt.f32.partialorder %v328_v12, 0.0 }
 0xb22   :  { %v331_v6 = vpop.xlane.xlu1 %330 }
 0xb23   :  { %vm333_vm9 = vcmp.gt.f32.partialorder %v331_v6, 0.0 }
 0xbb8   :  { %v2006_v13 = vpop.f32.mrb[16].mxu0 }
 0xbb9   :  { %v1774_v14 = vadd.f32 %v2006_v13, %v1858_v8  ;;  %v1768_v15 = vpop.f32.mrb[17].mxu0 }
 0xbba   :  { %v1769_v33 = vadd.f32 %v1858_v8, %v1768_v15 }
 0xbbb   :  { %v1782_v16 = vsel %vm333_vm9, %v1774_v14, 0.0 }
 0xbbc   :  { %1784 = vst.msk [vmem:[#allocation13 + $0x8] sm:$0xff] %vm133_vm0, %v1782_v16  ;;  %v1781_v17 = vsel %vm332_vm10, %v1769_v33, 0.0 }
 0xbbd   :  { %1783 = vst.msk [vmem:[#allocation13] sm:$0xff] %vm133_vm0, %v1781_v17 }
 0xbbe   :  { %2245 = shalt.err (!%p2242_p4)
}
 0xbbf   :  { %s2246_s29 = scalar_lea.hbm %s2688_s9, 256 }
 0xbc0   :  { %p2247_p5 = scmp.ne.s32.totalorder %s2688_s9, %s2246_s29  ;;  %p2250_p6 = scmp.lt.u32.totalorder %s2246_s29, %s2688_s9 }
 0xbc2   :  { %p2252_p7 = pnand %p2250_p6, %p2247_p5 }
 0xbc4   :  { %2255 = shalt.err (!%p2252_p7)
}
 0xbc5   :  { %1804 = dma.vmem_to_hbm [thread:$0]  %s1799_s7, 256, %s2688_s9, [#allocation4], %s2270_s25, %s2270_s25, %s2271_s26  }
 0xbc6   :  { %2264 = dma.done.wait [#allocation4], 256  }
 0xbc7   :  { %2265 = vsyncadd [#allocation4], 4294967040 }
 0xbc8   :  { %2266 = dma.done.wait [#allocation15], 1024  }
 0xbc9   :  { %2267 = vsyncadd [#allocation15], 4294966272 }
 0xbca   :  { %1823 = vsyncpa [#allocation3], 1 }
 0xbcb   :  { %1824 = vsyncpa [#allocation6], 1 }
 0xbcc   :  { %1825 = vsyncpa [#allocation9], 1 }
 0xbcd   :  { %1826 = vsyncpa [#allocation12], 1 }
 0xbce   :  { %1827 = vsyncpa [#allocation4], 1 }
 0xbcf   :  { %1828 = vsyncpa [#allocation15], 1 }

</bundles_post_ra>
